<compile_context>
chip_gen: v5e
topology: v5e:2x2
jax: 0.10.0
libtpu: 0.0.40
codegen_flags: <defaults>
</compile_context>

<pallas_src>
import functools

import jax
import jax.numpy as jnp
import numpy as np
from jax.experimental import pallas as pl
from jax.experimental.pallas import tpu as pltpu


def _lstm_fc_kernel(x_ref, p_ref, q_ref, wih_ref, whh_ref, b_ref, wfc_ref, bfc_ref,
                    out_ref, hN_ref, cN_ref,
                    *, seq_len, batch, pad_batch, hidden_size):
    """Whole LSTM + FC forward in one invocation.

    x_ref   : (B*T, I)      batch-major flattened input (row b*T + t)
    p_ref   : (T*PB, B*T)   0/1 selector: batch-major rows -> padded time-major rows
    q_ref   : (B*T, T*PB)   0/1 selector: padded time-major h rows -> batch-major rows
    wih_ref : (I, 4H)       W_ih^T
    whh_ref : (H, 4H)       W_hh^T
    b_ref   : (1, 4H)       b_ih + b_hh
    wfc_ref : (H, I)        W_fc^T
    bfc_ref : (1, I)        b_fc
    out_ref : (B*T, I)      fc(h_t), batch-major (torch's out.view(-1,H) @ fc order)
    hN_ref  : (B, H)        final hidden state
    cN_ref  : (B, H)        final cell state
    """
    T, B, PB, H = seq_len, batch, pad_batch, hidden_size

    # (1) Hoisted input projection over every (batch, time) row at once, bias folded in.
    gx_bm = (jnp.dot(x_ref[...], wih_ref[...], preferred_element_type=jnp.float32)
             + b_ref[...])                                     # (B*T, 4H), gate order i,f,g,o

    # (2) Reorder to time-major with the batch padded to 8 sublanes using one tiny MXU
    #     matmul (P has zero rows for padding, so padded rows stay exactly 0 and h/c of
    #     padded rows remain 0 through the whole recurrence). Each per-step slice below
    #     is a full aligned (8, 128) tile -> no sublane shuffles on the serial path.
    gates_tm = jnp.dot(p_ref[...], gx_bm, preferred_element_type=jnp.float32)  # (T*PB, 4H)

    whh = whh_ref[...]                                          # hoisted out of the loop

    h = jnp.zeros((PB, H), jnp.float32)
    c = jnp.zeros((PB, H), jnp.float32)
    hs = []

    # (3) Recurrence fully unrolled (T small & static). Only h @ W_hh^T (4H == 128,
    #     exactly one lane tile) is on the serial critical path.
    for t in range(T):
        g = gates_tm[t * PB:(t + 1) * PB, :] + jnp.dot(
            h, whh, preferred_element_type=jnp.float32)         # (PB, 4H), one aligned vreg
        sig = jax.nn.sigmoid(g)                                 # one full-vreg EUP pass
        tnh = jnp.tanh(g)                                       # one full-vreg EUP pass
        i_g = sig[:, 0 * H:1 * H]
        f_g = sig[:, 1 * H:2 * H]
        g_g = tnh[:, 2 * H:3 * H]
        o_g = sig[:, 3 * H:4 * H]
        c = f_g * c + i_g * g_g
        h = o_g * jnp.tanh(c)
        hs.append(h)                                            # stays in vregs, no scratch

    # (4) FC head once over the whole sequence; Q restores torch's batch-major row
    #     order (b*T + t) so the wrapper needs no transpose on the output.
    hseq = jnp.concatenate(hs, axis=0)                          # (T*PB, H)
    h_bm = jnp.dot(q_ref[...], hseq, preferred_element_type=jnp.float32)      # (B*T, H)
    out_ref[...] = (jnp.dot(h_bm, wfc_ref[...], preferred_element_type=jnp.float32)
                    + bfc_ref[...]).astype(out_ref.dtype)

    # Final states written exactly once (drop the padded rows).
    hN_ref[...] = h[0:B, :].astype(hN_ref.dtype)
    cN_ref[...] = c[0:B, :].astype(cN_ref.dtype)


@jax.jit
def net_forward(x, params):
    """x: (B, T, n_inputs) float32. Returns (out, (h_n, c_n)) matching the torch module."""
    B, T, I = x.shape
    H = params["w_hh"].shape[1]
    PB = max(8, ((B + 7) // 8) * 8)                             # batch padded to sublane tile

    # Kernel-layout weights (tiny; fused inside the single jitted executable).
    w_ih_t = params["w_ih"].T                                   # (I, 4H)
    w_hh_t = params["w_hh"].T                                   # (H, 4H)
    b = (params["b_ih"] + params["b_hh"]).reshape(1, 4 * H)     # (1, 4H)
    w_fc_t = params["w_fc"].T                                   # (H, I)
    b_fc = params["b_fc"].reshape(1, I)                         # (1, I)

    # Batch-major flatten is a free bitcast reshape (no transpose anywhere in the wrapper).
    x2d = x.reshape(B * T, I)

    # Trace-time 0/1 selection matrices (baked constants): batch-major <-> padded time-major.
    P = np.zeros((T * PB, B * T), np.float32)
    Q = np.zeros((B * T, T * PB), np.float32)
    for t in range(T):
        for bb in range(B):
            P[t * PB + bb, bb * T + t] = 1.0
            Q[bb * T + t, t * PB + bb] = 1.0
    P = jnp.asarray(P)
    Q = jnp.asarray(Q)

    kernel = functools.partial(_lstm_fc_kernel, seq_len=T, batch=B,
                               pad_batch=PB, hidden_size=H)
    vmem = pl.BlockSpec(memory_space=pltpu.MemorySpace.VMEM)    # whole array resident in VMEM

    out, h_n, c_n = pl.pallas_call(
        kernel,
        out_shape=(
            jax.ShapeDtypeStruct((B * T, I), jnp.float32),
            jax.ShapeDtypeStruct((B, H), jnp.float32),
            jax.ShapeDtypeStruct((B, H), jnp.float32),
        ),
        in_specs=[vmem] * 8,
        out_specs=(vmem, vmem, vmem),
    )(x2d, P, Q, w_ih_t, w_hh_t, b, w_fc_t, b_fc)

    hidden = (h_n[None, ...], c_n[None, ...])                   # (n_layers=1, B, H); free expand
    return out, hidden


def _reference_forward(x, params):
    """Pure-JAX LSTM reference (PyTorch gate order i,f,g,o) for correctness check."""
    B, T, I = x.shape
    H = params["w_hh"].shape[1]
    w_ih, w_hh = params["w_ih"], params["w_hh"]
    b = params["b_ih"] + params["b_hh"]

    def step(carry, x_t):
        h, c = carry
        gates = x_t @ w_ih.T + h @ w_hh.T + b
        i = jax.nn.sigmoid(gates[:, 0 * H:1 * H])
        f = jax.nn.sigmoid(gates[:, 1 * H:2 * H])
        g = jnp.tanh(gates[:, 2 * H:3 * H])
        o = jax.nn.sigmoid(gates[:, 3 * H:4 * H])
        c = f * c + i * g
        h = o * jnp.tanh(c)
        return (h, c), h

    h0 = jnp.zeros((B, H), jnp.float32)
    c0 = jnp.zeros((B, H), jnp.float32)
    (h_n, c_n), hs = jax.lax.scan(step, (h0, c0), jnp.transpose(x, (1, 0, 2)))
    out = jnp.transpose(hs, (1, 0, 2)).reshape(B * T, H)
    out = out @ params["w_fc"].T + params["b_fc"]
    return out, (h_n[None], c_n[None])


def init_params(key, n_inputs, hidden_size):
    """Deterministic init mimicking PyTorch's U(-1/sqrt(H), 1/sqrt(H))."""
    k = 1.0 / np.sqrt(hidden_size)
    keys = jax.random.split(key, 6)
    u = lambda kk, shape: jax.random.uniform(kk, shape, jnp.float32, -k, k)
    return {
        "w_ih": u(keys[0], (4 * hidden_size, n_inputs)),
        "w_hh": u(keys[1], (4 * hidden_size, hidden_size)),
        "b_ih": u(keys[2], (4 * hidden_size,)),
        "b_hh": u(keys[3], (4 * hidden_size,)),
        "w_fc": u(keys[4], (n_inputs, hidden_size)),
        "b_fc": u(keys[5], (n_inputs,)),
    }


if __name__ == "__main__":
    B, T, n_inputs, hidden_size = 2, 8, 16, 32

    key = jax.random.PRNGKey(0)
    kx, kp = jax.random.split(key)
    x = jax.random.normal(kx, (B, T, n_inputs), jnp.float32)
    params = init_params(kp, n_inputs, hidden_size)

    out, (h_n, c_n) = jax.block_until_ready(net_forward(x, params))

    out_ref, (h_ref, c_ref) = _reference_forward(x, params)
    np.testing.assert_allclose(np.asarray(out), np.asarray(out_ref), rtol=1e-4, atol=1e-4)
    np.testing.assert_allclose(np.asarray(h_n), np.asarray(h_ref), rtol=1e-4, atol=1e-4)
    np.testing.assert_allclose(np.asarray(c_n), np.asarray(c_ref), rtol=1e-4, atol=1e-4)

    assert out.shape == (B * T, n_inputs)
    assert h_n.shape == (1, B, hidden_size) and c_n.shape == (1, B, hidden_size)
    print("KERNEL_OK")
</pallas_src>

<mosaic_0001>
module attributes {stable_mosaic.version = 11 : i64} {
  func.func @_lstm_fc_kernel(%arg0: memref<16x16xf32, #tpu.memory_space<vmem>>, %arg1: memref<64x16xf32, #tpu.memory_space<vmem>>, %arg2: memref<16x64xf32, #tpu.memory_space<vmem>>, %arg3: memref<16x128xf32, #tpu.memory_space<vmem>>, %arg4: memref<32x128xf32, #tpu.memory_space<vmem>>, %arg5: memref<1x128xf32, #tpu.memory_space<vmem>>, %arg6: memref<32x16xf32, #tpu.memory_space<vmem>>, %arg7: memref<1x16xf32, #tpu.memory_space<vmem>>, %arg8: memref<16x16xf32, #tpu.memory_space<vmem>>, %arg9: memref<2x32xf32, #tpu.memory_space<vmem>>, %arg10: memref<2x32xf32, #tpu.memory_space<vmem>>) attributes {dimension_semantics = [], scalar_prefetch = 0 : i64, scratch_operands = 0 : i64, tpu.core_type = #tpu.core_type<tc>} {
    %c0 = arith.constant 0 : index
    %c0_0 = arith.constant 0 : index
    %0 = vector.load %arg0[%c0, %c0_0] : memref<16x16xf32, #tpu.memory_space<vmem>>, vector<16x16xf32>
    %c0_1 = arith.constant 0 : index
    %c0_2 = arith.constant 0 : index
    %1 = vector.load %arg3[%c0_1, %c0_2] : memref<16x128xf32, #tpu.memory_space<vmem>>, vector<16x128xf32>
    %cst = arith.constant dense<0.000000e+00> : vector<16x128xf32>
    %2 = tpu.matmul %0, %1, %cst {dimension_numbers = #tpu.dot_dimension_numbers<[1], [0], [0], [1], [0, 0, 1, 1], [], []>} : vector<16x16xf32>, vector<16x128xf32>, vector<16x128xf32> -> vector<16x128xf32>
    %c0_3 = arith.constant 0 : index
    %c0_4 = arith.constant 0 : index
    %3 = vector.load %arg5[%c0_3, %c0_4] : memref<1x128xf32, #tpu.memory_space<vmem>>, vector<1x128xf32>
    %4 = vector.broadcast %3 : vector<1x128xf32> to vector<16x128xf32>
    %5 = arith.addf %2, %4 : vector<16x128xf32>
    %c0_5 = arith.constant 0 : index
    %c0_6 = arith.constant 0 : index
    %6 = vector.load %arg1[%c0_5, %c0_6] : memref<64x16xf32, #tpu.memory_space<vmem>>, vector<64x16xf32>
    %cst_7 = arith.constant dense<0.000000e+00> : vector<64x128xf32>
    %7 = tpu.matmul %6, %5, %cst_7 {dimension_numbers = #tpu.dot_dimension_numbers<[1], [0], [0], [1], [0, 0, 1, 1], [], []>} : vector<64x16xf32>, vector<16x128xf32>, vector<64x128xf32> -> vector<64x128xf32>
    %c0_8 = arith.constant 0 : index
    %c0_9 = arith.constant 0 : index
    %8 = vector.load %arg4[%c0_8, %c0_9] : memref<32x128xf32, #tpu.memory_space<vmem>>, vector<32x128xf32>
    %cst_10 = arith.constant 0.000000e+00 : f32
    %9 = vector.broadcast %cst_10 : f32 to vector<8x32xf32>
    %cst_11 = arith.constant 0.000000e+00 : f32
    %10 = vector.broadcast %cst_11 : f32 to vector<8x32xf32>
    %11 = vector.extract_strided_slice %7 {offsets = [0, 0], sizes = [8, 128], strides = [1, 1]} : vector<64x128xf32> to vector<8x128xf32>
    %cst_12 = arith.constant dense<0.000000e+00> : vector<8x128xf32>
    %12 = tpu.matmul %9, %8, %cst_12 {dimension_numbers = #tpu.dot_dimension_numbers<[1], [0], [0], [1], [0, 0, 1, 1], [], []>} : vector<8x32xf32>, vector<32x128xf32>, vector<8x128xf32> -> vector<8x128xf32>
    %13 = arith.addf %11, %12 : vector<8x128xf32>
    %14 = arith.negf %13 : vector<8x128xf32>
    %15 = math.exp %14 : vector<8x128xf32>
    %cst_13 = arith.constant 1.000000e+00 : f32
    %16 = vector.broadcast %cst_13 : f32 to vector<8x128xf32>
    %17 = arith.addf %16, %15 : vector<8x128xf32>
    %18 = arith.divf %16, %17 : vector<8x128xf32>
    %19 = math.tanh %13 : vector<8x128xf32>
    %20 = vector.extract_strided_slice %18 {offsets = [0, 0], sizes = [8, 32], strides = [1, 1]} : vector<8x128xf32> to vector<8x32xf32>
    %21 = vector.extract_strided_slice %18 {offsets = [0, 32], sizes = [8, 32], strides = [1, 1]} : vector<8x128xf32> to vector<8x32xf32>
    %22 = vector.extract_strided_slice %19 {offsets = [0, 64], sizes = [8, 32], strides = [1, 1]} : vector<8x128xf32> to vector<8x32xf32>
    %23 = vector.extract_strided_slice %18 {offsets = [0, 96], sizes = [8, 32], strides = [1, 1]} : vector<8x128xf32> to vector<8x32xf32>
    %24 = arith.mulf %21, %10 : vector<8x32xf32>
    %25 = arith.mulf %20, %22 : vector<8x32xf32>
    %26 = arith.addf %24, %25 : vector<8x32xf32>
    %27 = math.tanh %26 : vector<8x32xf32>
    %28 = arith.mulf %23, %27 : vector<8x32xf32>
    %29 = vector.extract_strided_slice %7 {offsets = [8, 0], sizes = [8, 128], strides = [1, 1]} : vector<64x128xf32> to vector<8x128xf32>
    %cst_14 = arith.constant dense<0.000000e+00> : vector<8x128xf32>
    %30 = tpu.matmul %28, %8, %cst_14 {dimension_numbers = #tpu.dot_dimension_numbers<[1], [0], [0], [1], [0, 0, 1, 1], [], []>} : vector<8x32xf32>, vector<32x128xf32>, vector<8x128xf32> -> vector<8x128xf32>
    %31 = arith.addf %29, %30 : vector<8x128xf32>
    %32 = arith.negf %31 : vector<8x128xf32>
    %33 = math.exp %32 : vector<8x128xf32>
    %cst_15 = arith.constant 1.000000e+00 : f32
    %34 = vector.broadcast %cst_15 : f32 to vector<8x128xf32>
    %35 = arith.addf %34, %33 : vector<8x128xf32>
    %36 = arith.divf %34, %35 : vector<8x128xf32>
    %37 = math.tanh %31 : vector<8x128xf32>
    %38 = vector.extract_strided_slice %36 {offsets = [0, 0], sizes = [8, 32], strides = [1, 1]} : vector<8x128xf32> to vector<8x32xf32>
    %39 = vector.extract_strided_slice %36 {offsets = [0, 32], sizes = [8, 32], strides = [1, 1]} : vector<8x128xf32> to vector<8x32xf32>
    %40 = vector.extract_strided_slice %37 {offsets = [0, 64], sizes = [8, 32], strides = [1, 1]} : vector<8x128xf32> to vector<8x32xf32>
    %41 = vector.extract_strided_slice %36 {offsets = [0, 96], sizes = [8, 32], strides = [1, 1]} : vector<8x128xf32> to vector<8x32xf32>
    %42 = arith.mulf %39, %26 : vector<8x32xf32>
    %43 = arith.mulf %38, %40 : vector<8x32xf32>
    %44 = arith.addf %42, %43 : vector<8x32xf32>
    %45 = math.tanh %44 : vector<8x32xf32>
    %46 = arith.mulf %41, %45 : vector<8x32xf32>
    %47 = vector.extract_strided_slice %7 {offsets = [16, 0], sizes = [8, 128], strides = [1, 1]} : vector<64x128xf32> to vector<8x128xf32>
    %cst_16 = arith.constant dense<0.000000e+00> : vector<8x128xf32>
    %48 = tpu.matmul %46, %8, %cst_16 {dimension_numbers = #tpu.dot_dimension_numbers<[1], [0], [0], [1], [0, 0, 1, 1], [], []>} : vector<8x32xf32>, vector<32x128xf32>, vector<8x128xf32> -> vector<8x128xf32>
    %49 = arith.addf %47, %48 : vector<8x128xf32>
    %50 = arith.negf %49 : vector<8x128xf32>
    %51 = math.exp %50 : vector<8x128xf32>
    %cst_17 = arith.constant 1.000000e+00 : f32
    %52 = vector.broadcast %cst_17 : f32 to vector<8x128xf32>
    %53 = arith.addf %52, %51 : vector<8x128xf32>
    %54 = arith.divf %52, %53 : vector<8x128xf32>
    %55 = math.tanh %49 : vector<8x128xf32>
    %56 = vector.extract_strided_slice %54 {offsets = [0, 0], sizes = [8, 32], strides = [1, 1]} : vector<8x128xf32> to vector<8x32xf32>
    %57 = vector.extract_strided_slice %54 {offsets = [0, 32], sizes = [8, 32], strides = [1, 1]} : vector<8x128xf32> to vector<8x32xf32>
    %58 = vector.extract_strided_slice %55 {offsets = [0, 64], sizes = [8, 32], strides = [1, 1]} : vector<8x128xf32> to vector<8x32xf32>
    %59 = vector.extract_strided_slice %54 {offsets = [0, 96], sizes = [8, 32], strides = [1, 1]} : vector<8x128xf32> to vector<8x32xf32>
    %60 = arith.mulf %57, %44 : vector<8x32xf32>
    %61 = arith.mulf %56, %58 : vector<8x32xf32>
    %62 = arith.addf %60, %61 : vector<8x32xf32>
    %63 = math.tanh %62 : vector<8x32xf32>
    %64 = arith.mulf %59, %63 : vector<8x32xf32>
    %65 = vector.extract_strided_slice %7 {offsets = [24, 0], sizes = [8, 128], strides = [1, 1]} : vector<64x128xf32> to vector<8x128xf32>
    %cst_18 = arith.constant dense<0.000000e+00> : vector<8x128xf32>
    %66 = tpu.matmul %64, %8, %cst_18 {dimension_numbers = #tpu.dot_dimension_numbers<[1], [0], [0], [1], [0, 0, 1, 1], [], []>} : vector<8x32xf32>, vector<32x128xf32>, vector<8x128xf32> -> vector<8x128xf32>
    %67 = arith.addf %65, %66 : vector<8x128xf32>
    %68 = arith.negf %67 : vector<8x128xf32>
    %69 = math.exp %68 : vector<8x128xf32>
    %cst_19 = arith.constant 1.000000e+00 : f32
    %70 = vector.broadcast %cst_19 : f32 to vector<8x128xf32>
    %71 = arith.addf %70, %69 : vector<8x128xf32>
    %72 = arith.divf %70, %71 : vector<8x128xf32>
    %73 = math.tanh %67 : vector<8x128xf32>
    %74 = vector.extract_strided_slice %72 {offsets = [0, 0], sizes = [8, 32], strides = [1, 1]} : vector<8x128xf32> to vector<8x32xf32>
    %75 = vector.extract_strided_slice %72 {offsets = [0, 32], sizes = [8, 32], strides = [1, 1]} : vector<8x128xf32> to vector<8x32xf32>
    %76 = vector.extract_strided_slice %73 {offsets = [0, 64], sizes = [8, 32], strides = [1, 1]} : vector<8x128xf32> to vector<8x32xf32>
    %77 = vector.extract_strided_slice %72 {offsets = [0, 96], sizes = [8, 32], strides = [1, 1]} : vector<8x128xf32> to vector<8x32xf32>
    %78 = arith.mulf %75, %62 : vector<8x32xf32>
    %79 = arith.mulf %74, %76 : vector<8x32xf32>
    %80 = arith.addf %78, %79 : vector<8x32xf32>
    %81 = math.tanh %80 : vector<8x32xf32>
    %82 = arith.mulf %77, %81 : vector<8x32xf32>
    %83 = vector.extract_strided_slice %7 {offsets = [32, 0], sizes = [8, 128], strides = [1, 1]} : vector<64x128xf32> to vector<8x128xf32>
    %cst_20 = arith.constant dense<0.000000e+00> : vector<8x128xf32>
    %84 = tpu.matmul %82, %8, %cst_20 {dimension_numbers = #tpu.dot_dimension_numbers<[1], [0], [0], [1], [0, 0, 1, 1], [], []>} : vector<8x32xf32>, vector<32x128xf32>, vector<8x128xf32> -> vector<8x128xf32>
    %85 = arith.addf %83, %84 : vector<8x128xf32>
    %86 = arith.negf %85 : vector<8x128xf32>
    %87 = math.exp %86 : vector<8x128xf32>
    %cst_21 = arith.constant 1.000000e+00 : f32
    %88 = vector.broadcast %cst_21 : f32 to vector<8x128xf32>
    %89 = arith.addf %88, %87 : vector<8x128xf32>
    %90 = arith.divf %88, %89 : vector<8x128xf32>
    %91 = math.tanh %85 : vector<8x128xf32>
    %92 = vector.extract_strided_slice %90 {offsets = [0, 0], sizes = [8, 32], strides = [1, 1]} : vector<8x128xf32> to vector<8x32xf32>
    %93 = vector.extract_strided_slice %90 {offsets = [0, 32], sizes = [8, 32], strides = [1, 1]} : vector<8x128xf32> to vector<8x32xf32>
    %94 = vector.extract_strided_slice %91 {offsets = [0, 64], sizes = [8, 32], strides = [1, 1]} : vector<8x128xf32> to vector<8x32xf32>
    %95 = vector.extract_strided_slice %90 {offsets = [0, 96], sizes = [8, 32], strides = [1, 1]} : vector<8x128xf32> to vector<8x32xf32>
    %96 = arith.mulf %93, %80 : vector<8x32xf32>
    %97 = arith.mulf %92, %94 : vector<8x32xf32>
    %98 = arith.addf %96, %97 : vector<8x32xf32>
    %99 = math.tanh %98 : vector<8x32xf32>
    %100 = arith.mulf %95, %99 : vector<8x32xf32>
    %101 = vector.extract_strided_slice %7 {offsets = [40, 0], sizes = [8, 128], strides = [1, 1]} : vector<64x128xf32> to vector<8x128xf32>
    %cst_22 = arith.constant dense<0.000000e+00> : vector<8x128xf32>
    %102 = tpu.matmul %100, %8, %cst_22 {dimension_numbers = #tpu.dot_dimension_numbers<[1], [0], [0], [1], [0, 0, 1, 1], [], []>} : vector<8x32xf32>, vector<32x128xf32>, vector<8x128xf32> -> vector<8x128xf32>
    %103 = arith.addf %101, %102 : vector<8x128xf32>
    %104 = arith.negf %103 : vector<8x128xf32>
    %105 = math.exp %104 : vector<8x128xf32>
    %cst_23 = arith.constant 1.000000e+00 : f32
    %106 = vector.broadcast %cst_23 : f32 to vector<8x128xf32>
    %107 = arith.addf %106, %105 : vector<8x128xf32>
    %108 = arith.divf %106, %107 : vector<8x128xf32>
    %109 = math.tanh %103 : vector<8x128xf32>
    %110 = vector.extract_strided_slice %108 {offsets = [0, 0], sizes = [8, 32], strides = [1, 1]} : vector<8x128xf32> to vector<8x32xf32>
    %111 = vector.extract_strided_slice %108 {offsets = [0, 32], sizes = [8, 32], strides = [1, 1]} : vector<8x128xf32> to vector<8x32xf32>
    %112 = vector.extract_strided_slice %109 {offsets = [0, 64], sizes = [8, 32], strides = [1, 1]} : vector<8x128xf32> to vector<8x32xf32>
    %113 = vector.extract_strided_slice %108 {offsets = [0, 96], sizes = [8, 32], strides = [1, 1]} : vector<8x128xf32> to vector<8x32xf32>
    %114 = arith.mulf %111, %98 : vector<8x32xf32>
    %115 = arith.mulf %110, %112 : vector<8x32xf32>
    %116 = arith.addf %114, %115 : vector<8x32xf32>
    %117 = math.tanh %116 : vector<8x32xf32>
    %118 = arith.mulf %113, %117 : vector<8x32xf32>
    %119 = vector.extract_strided_slice %7 {offsets = [48, 0], sizes = [8, 128], strides = [1, 1]} : vector<64x128xf32> to vector<8x128xf32>
    %cst_24 = arith.constant dense<0.000000e+00> : vector<8x128xf32>
    %120 = tpu.matmul %118, %8, %cst_24 {dimension_numbers = #tpu.dot_dimension_numbers<[1], [0], [0], [1], [0, 0, 1, 1], [], []>} : vector<8x32xf32>, vector<32x128xf32>, vector<8x128xf32> -> vector<8x128xf32>
    %121 = arith.addf %119, %120 : vector<8x128xf32>
    %122 = arith.negf %121 : vector<8x128xf32>
    %123 = math.exp %122 : vector<8x128xf32>
    %cst_25 = arith.constant 1.000000e+00 : f32
    %124 = vector.broadcast %cst_25 : f32 to vector<8x128xf32>
    %125 = arith.addf %124, %123 : vector<8x128xf32>
    %126 = arith.divf %124, %125 : vector<8x128xf32>
    %127 = math.tanh %121 : vector<8x128xf32>
    %128 = vector.extract_strided_slice %126 {offsets = [0, 0], sizes = [8, 32], strides = [1, 1]} : vector<8x128xf32> to vector<8x32xf32>
    %129 = vector.extract_strided_slice %126 {offsets = [0, 32], sizes = [8, 32], strides = [1, 1]} : vector<8x128xf32> to vector<8x32xf32>
    %130 = vector.extract_strided_slice %127 {offsets = [0, 64], sizes = [8, 32], strides = [1, 1]} : vector<8x128xf32> to vector<8x32xf32>
    %131 = vector.extract_strided_slice %126 {offsets = [0, 96], sizes = [8, 32], strides = [1, 1]} : vector<8x128xf32> to vector<8x32xf32>
    %132 = arith.mulf %129, %116 : vector<8x32xf32>
    %133 = arith.mulf %128, %130 : vector<8x32xf32>
    %134 = arith.addf %132, %133 : vector<8x32xf32>
    %135 = math.tanh %134 : vector<8x32xf32>
    %136 = arith.mulf %131, %135 : vector<8x32xf32>
    %137 = vector.extract_strided_slice %7 {offsets = [56, 0], sizes = [8, 128], strides = [1, 1]} : vector<64x128xf32> to vector<8x128xf32>
    %cst_26 = arith.constant dense<0.000000e+00> : vector<8x128xf32>
    %138 = tpu.matmul %136, %8, %cst_26 {dimension_numbers = #tpu.dot_dimension_numbers<[1], [0], [0], [1], [0, 0, 1, 1], [], []>} : vector<8x32xf32>, vector<32x128xf32>, vector<8x128xf32> -> vector<8x128xf32>
    %139 = arith.addf %137, %138 : vector<8x128xf32>
    %140 = arith.negf %139 : vector<8x128xf32>
    %141 = math.exp %140 : vector<8x128xf32>
    %cst_27 = arith.constant 1.000000e+00 : f32
    %142 = vector.broadcast %cst_27 : f32 to vector<8x128xf32>
    %143 = arith.addf %142, %141 : vector<8x128xf32>
    %144 = arith.divf %142, %143 : vector<8x128xf32>
    %145 = math.tanh %139 : vector<8x128xf32>
    %146 = vector.extract_strided_slice %144 {offsets = [0, 0], sizes = [8, 32], strides = [1, 1]} : vector<8x128xf32> to vector<8x32xf32>
    %147 = vector.extract_strided_slice %144 {offsets = [0, 32], sizes = [8, 32], strides = [1, 1]} : vector<8x128xf32> to vector<8x32xf32>
    %148 = vector.extract_strided_slice %145 {offsets = [0, 64], sizes = [8, 32], strides = [1, 1]} : vector<8x128xf32> to vector<8x32xf32>
    %149 = vector.extract_strided_slice %144 {offsets = [0, 96], sizes = [8, 32], strides = [1, 1]} : vector<8x128xf32> to vector<8x32xf32>
    %150 = arith.mulf %147, %134 : vector<8x32xf32>
    %151 = arith.mulf %146, %148 : vector<8x32xf32>
    %152 = arith.addf %150, %151 : vector<8x32xf32>
    %153 = math.tanh %152 : vector<8x32xf32>
    %154 = arith.mulf %149, %153 : vector<8x32xf32>
    %155 = tpu.concatenate %28, %46, %64, %82, %100, %118, %136, %154 in 0 : vector<8x32xf32>, vector<8x32xf32>, vector<8x32xf32>, vector<8x32xf32>, vector<8x32xf32>, vector<8x32xf32>, vector<8x32xf32>, vector<8x32xf32> -> vector<64x32xf32>
    %c0_28 = arith.constant 0 : index
    %c0_29 = arith.constant 0 : index
    %156 = vector.load %arg2[%c0_28, %c0_29] : memref<16x64xf32, #tpu.memory_space<vmem>>, vector<16x64xf32>
    %cst_30 = arith.constant dense<0.000000e+00> : vector<16x32xf32>
    %157 = tpu.matmul %156, %155, %cst_30 {dimension_numbers = #tpu.dot_dimension_numbers<[1], [0], [0], [1], [0, 0, 1, 1], [], []>} : vector<16x64xf32>, vector<64x32xf32>, vector<16x32xf32> -> vector<16x32xf32>
    %c0_31 = arith.constant 0 : index
    %c0_32 = arith.constant 0 : index
    %158 = vector.load %arg6[%c0_31, %c0_32] : memref<32x16xf32, #tpu.memory_space<vmem>>, vector<32x16xf32>
    %cst_33 = arith.constant dense<0.000000e+00> : vector<16x16xf32>
    %159 = tpu.matmul %157, %158, %cst_33 {dimension_numbers = #tpu.dot_dimension_numbers<[1], [0], [0], [1], [0, 0, 1, 1], [], []>} : vector<16x32xf32>, vector<32x16xf32>, vector<16x16xf32> -> vector<16x16xf32>
    %c0_34 = arith.constant 0 : index
    %c0_35 = arith.constant 0 : index
    %160 = vector.load %arg7[%c0_34, %c0_35] : memref<1x16xf32, #tpu.memory_space<vmem>>, vector<1x16xf32>
    %161 = vector.broadcast %160 : vector<1x16xf32> to vector<16x16xf32>
    %162 = arith.addf %159, %161 : vector<16x16xf32>
    %c0_36 = arith.constant 0 : index
    %c0_37 = arith.constant 0 : index
    %163 = vector.load %arg8[%c0_36, %c0_37] : memref<16x16xf32, #tpu.memory_space<vmem>>, vector<16x16xf32>
    tpu.vector_store %arg8[%c0_36, %c0_37], %162 {strides = array<i32>} : memref<16x16xf32, #tpu.memory_space<vmem>>, vector<16x16xf32>,
    %164 = vector.extract_strided_slice %154 {offsets = [0, 0], sizes = [2, 32], strides = [1, 1]} : vector<8x32xf32> to vector<2x32xf32>
    %c0_38 = arith.constant 0 : index
    %c0_39 = arith.constant 0 : index
    %165 = vector.load %arg9[%c0_38, %c0_39] : memref<2x32xf32, #tpu.memory_space<vmem>>, vector<2x32xf32>
    tpu.vector_store %arg9[%c0_38, %c0_39], %164 {strides = array<i32>} : memref<2x32xf32, #tpu.memory_space<vmem>>, vector<2x32xf32>,
    %166 = vector.extract_strided_slice %152 {offsets = [0, 0], sizes = [2, 32], strides = [1, 1]} : vector<8x32xf32> to vector<2x32xf32>
    %c0_40 = arith.constant 0 : index
    %c0_41 = arith.constant 0 : index
    %167 = vector.load %arg10[%c0_40, %c0_41] : memref<2x32xf32, #tpu.memory_space<vmem>>, vector<2x32xf32>
    tpu.vector_store %arg10[%c0_40, %c0_41], %166 {strides = array<i32>} : memref<2x32xf32, #tpu.memory_space<vmem>>, vector<2x32xf32>,
    return
  }
}

</mosaic_0001>

<bundles_post_ra>
// kernel: net_forward.1
= control target key start
LH: loop header
LB: loop body
LE: loop exit
PB: predicated region body
PF: predicated region fallthrough
CT: control target
= control target key end

     0   :  { %16 = vsyncpa [#allocation3], 0  ;;  %s1350_s0 = inlined_call_operand.vmem [shape: f32[16,16], index: 0, kind: input, shape index: {}]   ;;  %s1351_s1 = inlined_call_operand.hbm [shape: f32[64,16], index: 1, kind: input, shape index: {}]   ;;  %s1352_s2 = inlined_call_operand.hbm [shape: f32[16,64], index: 2, kind: input, shape index: {}]   ;;  %s1353_s3 = inlined_call_operand.hbm [shape: f32[16,128], index: 3, kind: input, shape index: {}]   ;;  %s1354_s4 = inlined_call_operand.vmem [shape: f32[32,128], index: 4, kind: input, shape index: {}]   ;;  %s1355_s5 = inlined_call_operand.vmem [shape: f32[1,128], index: 5, kind: input, shape index: {}]   ;;  %s1356_s6 = inlined_call_operand.vmem [shape: f32[32,16], index: 6, kind: input, shape index: {}]   ;;  %s1357_s7 = inlined_call_operand.vmem [shape: f32[1,16], index: 7, kind: input, shape index: {}]   ;;  %s1358_s8 = inlined_call_operand.hbm [shape: f32[16,16], index: 8, kind: output, shape index: {0}]   ;;  %s1359_s9 = inlined_call_operand.hbm [shape: f32[2,32], index: 9, kind: output, shape index: {1}]   ;;  %s1360_s10 = inlined_call_operand.hbm [shape: f32[2,32], index: 10, kind: output, shape index: {2}]  }
   0x1   :  { %17 = vsyncpa [#allocation6], 0 }
   0x2   :  { %18 = vsyncpa [#allocation4], 0 }
   0x3   :  { %19 = vsyncpa [#allocation10], 0  ;;  %s39_s15 = sshll.u32 %s1352_s2, 4  ;;  %s1100_s16 = smov [#allocation5]   ;;  %s40_s15 = int_to_ptr.hbm [resolvable:$true] %s39_s15 }
   0x4   :  { %s41_s17 = sshll.u32 %s1100_s16, 4  ;;  %s26_s20 = sshll.u32 %s1351_s1, 4  ;;  %s42_s17 = int_to_ptr.vmem [resolvable:$true] %s41_s17  ;;  %s27_s20 = int_to_ptr.hbm [resolvable:$true] %s26_s20 }
   0x5   :  { %s1101_s21 = smov 128   ;;  %s1102_s22 = smov 8  }
   0x6   :  { %47 = dma.hbm_to_vmem [thread:$0]  %s40_s15, 256, %s42_s17, [#allocation6], %s1101_s21, %s1101_s21, %s1102_s22  }
   0x7   :  { %s1103_s23 = smov [#allocation2]   ;;  %s52_s2 = sshll.u32 %s1353_s3, 4  ;;  %s53_s2 = int_to_ptr.hbm [resolvable:$true] %s52_s2 }
   0x8   :  { %s28_s24 = sshll.u32 %s1103_s23, 4  ;;  %s1104_s1 = smov [#allocation7]   ;;  %s29_s24 = int_to_ptr.vmem [resolvable:$true] %s28_s24 }
   0x9   :  { %34 = dma.hbm_to_vmem [thread:$0]  %s27_s20, 1024, %s29_s24, [#allocation3], %s1101_s21, %s1101_s21, %s1102_s22  }
   0xa   :  { %s54_s27 = sshll.u32 %s1104_s1, 4  ;;  %s55_s27 = int_to_ptr.vmem [resolvable:$true] %s54_s27 }
   0xb   :  { %60 = dma.hbm_to_vmem [thread:$0]  %s53_s2, 256, %s55_s27, [#allocation6], %s1101_s21, %s1101_s21, %s1102_s22  }
   0xc   :  { %1092 = dma.done.wait [#allocation3], 1024  }
   0xd   :  { %1093 = vsyncadd [#allocation3], 4294966272 }
   0xe   :  { %1094 = dma.done.wait [#allocation6], 512  }
   0xf   :  { %1095 = vsyncadd [#allocation6], 4294966784  ;;  %v84_v0 = vld [vmem:[#allocation7 + $0x8] sm:$0xff]  ;;  %v83_v1 = vld [vmem:[#allocation7] sm:$0xff]  ;;  %vm89_vm0 = vcmask 130048   ;;  %v1105_v8 = vmov 0.0  }
  0x10   :  { %110 = vmatpush.msra.mxu0 %v84_v0  ;;  %v81_v2 = vld [vmem:[%s1350_s0] sm:$0xff]  ;;  %v82_v3 = vld [vmem:[%s1350_s0 + $0x8] sm:$0xff]  ;;  %v1196_v4 = vld [vmem:[%s1354_s4 + $0x18] sm:$0xff]  ;;  %s1107_s19 = smov 32   ;;  %vm196_vm5 = vcmask 261120   ;;  %s1108_s20 = smov 96  }
  0x11   :  { %212 = vmatpush.msra.mxu2 %v1196_v4  ;;  %v1202_v5 = vld [vmem:[%s1354_s4 + $0x10] sm:$0xff]  ;;  %275 = vmatpush.msra.mxu3 %v1196_v4  ;;  %v1208_v6 = vld [vmem:[%s1354_s4 + $0x8] sm:$0xff]  ;;  %v1215_v7 = vld [vmem:[%s1354_s4] sm:$0xff]  ;;  %s808_s11 = sshll.u32 %s1359_s9, 4  ;;  %s1110_s12 = smov [#allocation11]   ;;  %s809_s11 = int_to_ptr.hbm [resolvable:$true] %s808_s11 }
  0x12   :  { %111 = vmatpush.msra.mxu0 %v83_v1  ;;  %v882_v10 = vld [vmem:[%s1355_s5] ss:$0 sm:$0xff]  ;;  %s1106_s5 = smov 64   ;;  %v120_v40 = vld [vmem:[#allocation2 + $0x8] sm:$0xff]  ;;  %s817_s13 = sshll.u32 %s1110_s12, 4  ;;  %s818_s13 = int_to_ptr.vmem [resolvable:$true] %s817_s13 }
  0x13   :  { %839 = vmatmul.msk.f32.vlgmr.msra.gmra.mxu0 %vm89_vm0, %v81_v2  ;;  %213 = vmatpush.msra.mxu2 %v1202_v5  ;;  %v119_v14 = vld [vmem:[#allocation2] sm:$0xff]  ;;  %s819_s16 = sshll.u32 %s1360_s10, 4  ;;  %s1111_s9 = smov [#allocation8]   ;;  %s820_s16 = int_to_ptr.hbm [resolvable:$true] %s819_s16 }
  0x14   :  { %276 = vmatpush.msra.mxu3 %v1202_v5  ;;  %s792_s4 = sshll.u32 %s1111_s9, 4  ;;  %s793_s4 = int_to_ptr.vmem [resolvable:$true] %s792_s4 }
  0x15   :  { %214 = vmatpush.msra.mxu2 %v1208_v6 }
  0x16   :  { %277 = vmatpush.msra.mxu3 %v1208_v6 }
  0x17   :  { %215 = vmatpush.msra.mxu2 %v1215_v7 }
  0x18   :  { %278 = vmatpush.msra.mxu3 %v1215_v7  ;;  %216 = vmatmul.f32.vlgmr.msra.gmra.mxu2 %v1105_v8 }
  0x19   :  { %338 = vmatpush.msrb.mxu2 %v1196_v4 }
  0x1a   :  { %401 = vmatpush.msrb.mxu3 %v1196_v4 }
  0x1b   :  { %840 = vmatmul.msk.f32.gmra.mxu0 %vm89_vm0, %v82_v3  ;;  %339 = vmatpush.msrb.mxu2 %v1202_v5  ;;  %v121_v3 = vld [vmem:[#allocation2 + $0x10] sm:$0xff] }
  0x1c   :  { %402 = vmatpush.msrb.mxu3 %v1202_v5 }
  0x1d   :  { %340 = vmatpush.msrb.mxu2 %v1208_v6 }
  0x1e   :  { %403 = vmatpush.msrb.mxu3 %v1208_v6 }
  0x1f   :  { %341 = vmatpush.msrb.mxu2 %v1215_v7 }
  0x20   :  { %404 = vmatpush.msrb.mxu3 %v1215_v7 }
  0x21   :  { %527 = vmatpush.msra.mxu2 %v1196_v4 }
  0x23   :  { %528 = vmatpush.msra.mxu2 %v1202_v5 }
  0x25   :  { %529 = vmatpush.msra.mxu2 %v1208_v6 }
  0x27   :  { %530 = vmatpush.msra.mxu2 %v1215_v7 }
  0x90   :  { %v113_v9 = vpop.f32.mrf.mxu0 }
  0x91   :  { %v114_v13 = vadd.f32 %v882_v10, %v113_v9 }
  0x98   :  { %v116_v11 = vpop.f32.mrf.mxu0 }
  0x99   :  { %v117_v12 = vadd.f32 %v882_v10, %v116_v11 }
  0x9b   :  { %165 = vmatpush.msrb.mxu0 %v117_v12  ;;  %868 = vmatpush.msra.mxu1 %v117_v12  ;;  %v217_v15 = vpop.f32.mrf.mxu2 }
  0x9d   :  { %166 = vmatpush.msrb.mxu0 %v114_v13  ;;  %869 = vmatpush.msra.mxu1 %v114_v13 }
  0x9e   :  { %841 = vmatmul.msk.f32.vlgmr.msrb.gmra.mxu0 %vm89_vm0, %v119_v14  ;;  %843 = vmatmul.msk.f32.vlgmr.msra.gmra.mxu1 %vm89_vm0, %v121_v3 }
  0x9f   :  { %464 = vmatpush.msra.mxu0 %v1196_v4 }
  0xa1   :  { %465 = vmatpush.msra.mxu0 %v1202_v5 }
  0xa3   :  { %466 = vmatpush.msra.mxu0 %v1208_v6 }
  0xa5   :  { %467 = vmatpush.msra.mxu0 %v1215_v7 }
  0xa6   :  { %842 = vmatmul.msk.f32.gmra.mxu0 %vm89_vm0, %v120_v40 }
  0xa7   :  { %653 = vmatpush.msrb.mxu0 %v1196_v4 }
  0xa9   :  { %654 = vmatpush.msrb.mxu0 %v1202_v5 }
  0xab   :  { %655 = vmatpush.msrb.mxu0 %v1208_v6 }
  0xad   :  { %656 = vmatpush.msrb.mxu0 %v1215_v7 }
 0x11b   :  { %v168_v16 = vpop.f32.mrf.mxu0 }
 0x11c   :  { %v220_v17 = vadd.f32 %v217_v15, %v168_v16 }
 0x11e   :  { %884 = vtanh.f32 %v220_v17  ;;  %v849_v19 = vmul.f32 -1.442695, %v220_v17 }
 0x120   :  { %886 = vpow2.f32 %v849_v19 }
 0x123   :  { %v171_v42 = vpop.f32.mrf.mxu0 }
 0x124   :  { %v885_v18 = vpop.eup %884 }
 0x125   :  { %243 = vrot.lane.b32.xlu0 %v885_v18, %s1106_s5 }
 0x126   :  { %v887_v20 = vpop.eup %886 }
 0x127   :  { %v224_v21 = vadd.f32 1.0, %v887_v20 }
 0x129   :  { %888 = vrcp.f32 %v224_v21  ;;  %v236_v27 = vand.u32 2147483648, %v224_v21  ;;  %vm230_vm2 = vweird.f32 %v224_v21  ;;  %v234_v28 = vand.u32 2147483647, %v224_v21 }
 0x12b   :  { %v237_v30 = vor.u32 1.1754944e-38, %v236_v27  ;;  %vm235_vm4 = vcmp.eq.f32.partialorder %v234_v28, 8.507059e+37 }
 0x12f   :  { %v889_v22 = vpop.eup %888 }
 0x130   :  { %v226_v23 = vmul.f32 %v889_v22, %v224_v21  ;;  %vm231_vm1 = vweird.f32 %v889_v22 }
 0x131   :  { %vm232_vm3 = vmor %vm230_vm2, %vm231_vm1 }
 0x132   :  { %v227_v24 = vsub.f32 1.0, %v226_v23 }
 0x134   :  { %v228_v25 = vmul.f32 %v889_v22, %v227_v24 }
 0x136   :  { %v229_v26 = vadd.f32 %v889_v22, %v228_v25 }
 0x138   :  { %v233_v29 = vsel %vm232_vm3, %v889_v22, %v229_v26 }
 0x139   :  { %v238_v32 = vsel %vm235_vm4, %v237_v30, %v233_v29  ;;  %v122_v30 = vld [vmem:[#allocation2 + $0x18] sm:$0xff] }
 0x13a   :  { %v241_v34 = vmul.f32 0.0, %v238_v32  ;;  %844 = vmatmul.msk.f32.gmra.mxu1 %vm89_vm0, %v122_v30 }
 0x197   :  { %v244_v31 = vpop.permute.xlu0 %243 }
 0x198   :  { %v246_v33 = vmul.f32 %v244_v31, %v238_v32 }
 0x19a   :  { %248 = vrot.lane.b32.xlu0 %v246_v33, %s1107_s19 }
 0x20c   :  { %v249_v35 = vpop.permute.xlu0 %248 }
 0x20d   :  { %v251_v36 = vadd.f32 %v249_v35, %v241_v34 }
 0x20f   :  { %890 = vtanh.f32 %v251_v36 }
 0x215   :  { %v891_v37 = vpop.eup %890 }
 0x216   :  { %254 = vrot.lane.b32.xlu1 %v891_v37, %s1106_s5 }
 0x288   :  { %v255_v38 = vpop.permute.xlu1 %254 }
 0x289   :  { %v257_v39 = vmul.f32 %v255_v38, %v238_v32 }
 0x28b   :  { %259 = vrot.lane.b32.xlu1 %v257_v39, %s1107_s19 }
 0x2fd   :  { %v1250_v41 = vpop.permute.xlu1 %259 }
 0x2fe   :  { %850 = vmatmul.msk.f32.vlgmr.msra.gmra.mxu3 %vm196_vm5, %v1250_v41 }
 0x2ff   :  { %590 = vmatpush.msra.mxu3 %v1196_v4 }
 0x301   :  { %591 = vmatpush.msra.mxu3 %v1202_v5  ;;  %v174_v5 = vpop.f32.mrf.mxu1 }
 0x303   :  { %592 = vmatpush.msra.mxu3 %v1208_v6 }
 0x305   :  { %593 = vmatpush.msra.mxu3 %v1215_v7 }
 0x309   :  { %v177_v32 = vpop.f32.mrf.mxu1 }
 0x381   :  { %v280_v43 = vpop.f32.mrf.mxu3 }
 0x382   :  { %v283_v44 = vadd.f32 %v280_v43, %v171_v42 }
 0x384   :  { %892 = vtanh.f32 %v283_v44  ;;  %v851_v46 = vmul.f32 -1.442695, %v283_v44 }
 0x386   :  { %894 = vpow2.f32 %v851_v46 }
 0x38a   :  { %v893_v45 = vpop.eup %892 }
 0x38b   :  { %306 = vrot.lane.b32.xlu2 %v893_v45, %s1106_s5 }
 0x38c   :  { %v895_v47 = vpop.eup %894 }
 0x38d   :  { %v287_v48 = vadd.f32 1.0, %v895_v47 }
 0x38f   :  { %896 = vrcp.f32 %v287_v48  ;;  %v299_v54 = vand.u32 2147483648, %v287_v48  ;;  %vm293_vm7 = vweird.f32 %v287_v48  ;;  %v297_v55 = vand.u32 2147483647, %v287_v48 }
 0x391   :  { %v300_v57 = vor.u32 1.1754944e-38, %v299_v54  ;;  %vm298_vm9 = vcmp.eq.f32.partialorder %v297_v55, 8.507059e+37 }
 0x395   :  { %v897_v49 = vpop.eup %896 }
 0x396   :  { %v289_v50 = vmul.f32 %v897_v49, %v287_v48  ;;  %vm294_vm6 = vweird.f32 %v897_v49 }
 0x397   :  { %vm295_vm8 = vmor %vm293_vm7, %vm294_vm6 }
 0x398   :  { %v290_v51 = vsub.f32 1.0, %v289_v50 }
 0x39a   :  { %v291_v52 = vmul.f32 %v897_v49, %v290_v51 }
 0x39c   :  { %v292_v53 = vadd.f32 %v897_v49, %v291_v52 }
 0x39e   :  { %v296_v56 = vsel %vm295_vm8, %v897_v49, %v292_v53 }
 0x39f   :  { %v301_v59 = vsel %vm298_vm9, %v300_v57, %v296_v56 }
 0x3a0   :  { %v304_v61 = vmul.f32 %v301_v59, %v251_v36 }
 0x3e5   :  { %v307_v58 = vpop.permute.xlu2 %306 }
 0x3e6   :  { %v309_v60 = vmul.f32 %v307_v58, %v301_v59  ;;  %v123_v58 = vld [vmem:[#allocation2 + $0x20] sm:$0xff] }
 0x3e7   :  { %845 = vmatmul.msk.f32.gmra.mxu1 %vm89_vm0, %v123_v58 }
 0x3e8   :  { %311 = vrot.lane.b32.xlu2 %v309_v60, %s1107_s19 }
 0x442   :  { %v312_v62 = vpop.permute.xlu2 %311 }
 0x443   :  { %v314_v63 = vadd.f32 %v312_v62, %v304_v61 }
 0x445   :  { %898 = vtanh.f32 %v314_v63 }
 0x44b   :  { %v899_v0 = vpop.eup %898 }
 0x44c   :  { %317 = vrot.lane.b32.xlu0 %v899_v0, %s1106_s5 }
 0x464   :  { %v180_v60 = vpop.f32.mrf.mxu1 }
 0x4be   :  { %v318_v1 = vpop.permute.xlu0 %317 }
 0x4bf   :  { %v320_v2 = vmul.f32 %v318_v1, %v301_v59 }
 0x4c1   :  { %322 = vrot.lane.b32.xlu1 %v320_v2, %s1107_s19 }
 0x533   :  { %v1263_v4 = vpop.permute.xlu1 %322 }
 0x534   :  { %852 = vmatmul.msk.f32.vlgmr.msrb.gmra.mxu2 %vm196_vm5, %v1263_v4 }
 0x5b7   :  { %v343_v6 = vpop.f32.mrf.mxu2 }
 0x5b8   :  { %v346_v7 = vadd.f32 %v343_v6, %v174_v5 }
 0x5ba   :  { %900 = vtanh.f32 %v346_v7  ;;  %v853_v9 = vmul.f32 -1.442695, %v346_v7 }
 0x5bc   :  { %902 = vpow2.f32 %v853_v9 }
 0x5c0   :  { %v901_v8 = vpop.eup %900 }
 0x5c1   :  { %369 = vrot.lane.b32.xlu2 %v901_v8, %s1106_s5 }
 0x5c2   :  { %v903_v10 = vpop.eup %902 }
 0x5c3   :  { %v350_v11 = vadd.f32 1.0, %v903_v10 }
 0x5c5   :  { %904 = vrcp.f32 %v350_v11  ;;  %v362_v17 = vand.u32 2147483648, %v350_v11  ;;  %vm356_vm11 = vweird.f32 %v350_v11  ;;  %v360_v18 = vand.u32 2147483647, %v350_v11 }
 0x5c7   :  { %v363_v20 = vor.u32 1.1754944e-38, %v362_v17  ;;  %vm361_vm13 = vcmp.eq.f32.partialorder %v360_v18, 8.507059e+37 }
 0x5cb   :  { %v905_v12 = vpop.eup %904 }
 0x5cc   :  { %v352_v13 = vmul.f32 %v905_v12, %v350_v11  ;;  %vm357_vm10 = vweird.f32 %v905_v12 }
 0x5cd   :  { %vm358_vm12 = vmor %vm356_vm11, %vm357_vm10 }
 0x5ce   :  { %v353_v14 = vsub.f32 1.0, %v352_v13 }
 0x5d0   :  { %v354_v15 = vmul.f32 %v905_v12, %v353_v14 }
 0x5d2   :  { %v355_v16 = vadd.f32 %v905_v12, %v354_v15 }
 0x5d4   :  { %v359_v19 = vsel %vm358_vm12, %v905_v12, %v355_v16 }
 0x5d5   :  { %v364_v22 = vsel %vm361_vm13, %v363_v20, %v359_v19 }
 0x5d6   :  { %v367_v24 = vmul.f32 %v364_v22, %v314_v63 }
 0x61b   :  { %v370_v21 = vpop.permute.xlu2 %369 }
 0x61c   :  { %v372_v23 = vmul.f32 %v370_v21, %v364_v22 }
 0x61e   :  { %374 = vrot.lane.b32.xlu0 %v372_v23, %s1107_s19 }
 0x690   :  { %v375_v25 = vpop.permute.xlu0 %374 }
 0x691   :  { %v377_v26 = vadd.f32 %v375_v25, %v367_v24 }
 0x693   :  { %906 = vtanh.f32 %v377_v26 }
 0x699   :  { %v907_v27 = vpop.eup %906 }
 0x69a   :  { %380 = vrot.lane.b32.xlu1 %v907_v27, %s1106_s5 }
 0x70c   :  { %v381_v28 = vpop.permute.xlu1 %380 }
 0x70d   :  { %v383_v29 = vmul.f32 %v381_v28, %v364_v22  ;;  %v124_v22 = vld [vmem:[#allocation2 + $0x28] sm:$0xff] }
 0x70e   :  { %846 = vmatmul.msk.f32.gmra.mxu1 %vm89_vm0, %v124_v22 }
 0x70f   :  { %385 = vrot.lane.b32.xlu2 %v383_v29, %s1107_s19 }
 0x769   :  { %v1272_v31 = vpop.permute.xlu2 %385 }
 0x76a   :  { %854 = vmatmul.msk.f32.vlgmr.msrb.gmra.mxu3 %vm196_vm5, %v1272_v31 }
 0x78b   :  { %v183_v24 = vpop.f32.mrf.mxu1 }
 0x7ed   :  { %v406_v33 = vpop.f32.mrf.mxu3 }
 0x7ee   :  { %v409_v34 = vadd.f32 %v406_v33, %v177_v32 }
 0x7f0   :  { %908 = vtanh.f32 %v409_v34  ;;  %v855_v36 = vmul.f32 -1.442695, %v409_v34 }
 0x7f2   :  { %910 = vpow2.f32 %v855_v36 }
 0x7f6   :  { %v909_v35 = vpop.eup %908 }
 0x7f7   :  { %432 = vrot.lane.b32.xlu0 %v909_v35, %s1106_s5 }
 0x7f8   :  { %v911_v37 = vpop.eup %910 }
 0x7f9   :  { %v413_v38 = vadd.f32 1.0, %v911_v37 }
 0x7fb   :  { %912 = vrcp.f32 %v413_v38  ;;  %v425_v45 = vand.u32 2147483648, %v413_v38  ;;  %vm419_vm15 = vweird.f32 %v413_v38  ;;  %v423_v46 = vand.u32 2147483647, %v413_v38 }
 0x7fd   :  { %v426_v48 = vor.u32 1.1754944e-38, %v425_v45  ;;  %vm424_vm2 = vcmp.eq.f32.partialorder %v423_v46, 8.507059e+37 }
 0x801   :  { %v913_v39 = vpop.eup %912 }
 0x802   :  { %v415_v40 = vmul.f32 %v913_v39, %v413_v38  ;;  %vm420_vm14 = vweird.f32 %v913_v39 }
 0x803   :  { %vm421_vm1 = vmor %vm419_vm15, %vm420_vm14 }
 0x804   :  { %v416_v42 = vsub.f32 1.0, %v415_v40 }
 0x806   :  { %v417_v43 = vmul.f32 %v913_v39, %v416_v42 }
 0x808   :  { %v418_v44 = vadd.f32 %v913_v39, %v417_v43 }
 0x80a   :  { %v422_v47 = vsel %vm421_vm1, %v913_v39, %v418_v44 }
 0x80b   :  { %v427_v50 = vsel %vm424_vm2, %v426_v48, %v422_v47 }
 0x80c   :  { %v430_v52 = vmul.f32 %v427_v50, %v377_v26 }
 0x869   :  { %v433_v49 = vpop.permute.xlu0 %432 }
 0x86a   :  { %v435_v51 = vmul.f32 %v433_v49, %v427_v50 }
 0x86c   :  { %437 = vrot.lane.b32.xlu1 %v435_v51, %s1107_s19  ;;  %v125_v51 = vld [vmem:[#allocation2 + $0x30] sm:$0xff] }
 0x86d   :  { %847 = vmatmul.msk.f32.gmra.mxu1 %vm89_vm0, %v125_v51 }
 0x8de   :  { %v438_v53 = vpop.permute.xlu1 %437 }
 0x8df   :  { %v440_v54 = vadd.f32 %v438_v53, %v430_v52 }
 0x8e1   :  { %914 = vtanh.f32 %v440_v54 }
 0x8e7   :  { %v915_v55 = vpop.eup %914 }
 0x8e8   :  { %443 = vrot.lane.b32.xlu2 %v915_v55, %s1106_s5 }
 0x8ea   :  { %v186_v53 = vpop.f32.mrf.mxu1 }
 0x942   :  { %v444_v56 = vpop.permute.xlu2 %443 }
 0x943   :  { %v446_v57 = vmul.f32 %v444_v56, %v427_v50 }
 0x945   :  { %448 = vrot.lane.b32.xlu0 %v446_v57, %s1107_s19 }
 0x9b7   :  { %v1281_v59 = vpop.permute.xlu0 %448 }
 0x9b8   :  { %856 = vmatmul.msk.f32.vlgmr.msra.gmra.mxu0 %vm196_vm5, %v1281_v59 }
 0xa35   :  { %v469_v61 = vpop.f32.mrf.mxu0 }
 0xa36   :  { %v472_v62 = vadd.f32 %v469_v61, %v180_v60 }
 0xa38   :  { %916 = vtanh.f32 %v472_v62  ;;  %v857_v0 = vmul.f32 -1.442695, %v472_v62 }
 0xa3a   :  { %918 = vpow2.f32 %v857_v0 }
 0xa3e   :  { %v917_v63 = vpop.eup %916 }
 0xa3f   :  { %495 = vrot.lane.b32.xlu1 %v917_v63, %s1106_s5 }
 0xa40   :  { %v919_v1 = vpop.eup %918 }
 0xa41   :  { %v476_v2 = vadd.f32 1.0, %v919_v1 }
 0xa43   :  { %920 = vrcp.f32 %v476_v2  ;;  %v488_v9 = vand.u32 2147483648, %v476_v2  ;;  %vm482_vm4 = vweird.f32 %v476_v2  ;;  %v486_v10 = vand.u32 2147483647, %v476_v2 }
 0xa45   :  { %v489_v12 = vor.u32 1.1754944e-38, %v488_v9  ;;  %vm487_vm7 = vcmp.eq.f32.partialorder %v486_v10, 8.507059e+37 }
 0xa49   :  { %v921_v3 = vpop.eup %920 }
 0xa4a   :  { %v478_v5 = vmul.f32 %v921_v3, %v476_v2  ;;  %vm483_vm3 = vweird.f32 %v921_v3 }
 0xa4b   :  { %vm484_vm6 = vmor %vm482_vm4, %vm483_vm3 }
 0xa4c   :  { %v479_v6 = vsub.f32 1.0, %v478_v5 }
 0xa4e   :  { %v480_v7 = vmul.f32 %v921_v3, %v479_v6 }
 0xa50   :  { %v481_v8 = vadd.f32 %v921_v3, %v480_v7 }
 0xa52   :  { %v485_v11 = vsel %vm484_vm6, %v921_v3, %v481_v8  ;;  %vm781_vm6 = vcmask 254976  }
 0xa53   :  { %v490_v14 = vsel %vm487_vm7, %v489_v12, %v485_v11  ;;  %vm712_vm7 = vcmask 523264  }
 0xa54   :  { %v493_v16 = vmul.f32 %v490_v14, %v440_v54 }
 0xab1   :  { %v496_v13 = vpop.permute.xlu1 %495 }
 0xab2   :  { %v498_v15 = vmul.f32 %v496_v13, %v490_v14 }
 0xab4   :  { %500 = vrot.lane.b32.xlu2 %v498_v15, %s1107_s19 }
 0xb0e   :  { %v501_v17 = vpop.permute.xlu2 %500 }
 0xb0f   :  { %v503_v18 = vadd.f32 %v501_v17, %v493_v16  ;;  %v126_v16 = vld [vmem:[#allocation2 + $0x38] sm:$0xff] }
 0xb10   :  { %848 = vmatmul.msk.f32.gmra.mxu1 %vm89_vm0, %v126_v16 }
 0xb11   :  { %922 = vtanh.f32 %v503_v18 }
 0xb17   :  { %v923_v19 = vpop.eup %922 }
 0xb18   :  { %506 = vrot.lane.b32.xlu0 %v923_v19, %s1106_s5 }
 0xb8a   :  { %v507_v20 = vpop.permute.xlu0 %506 }
 0xb8b   :  { %v509_v21 = vmul.f32 %v507_v20, %v490_v14 }
 0xb8d   :  { %511 = vrot.lane.b32.xlu1 %v509_v21, %s1107_s19 }
 0xbff   :  { %v1290_v23 = vpop.permute.xlu1 %511 }
 0xc00   :  { %858 = vmatmul.msk.f32.vlgmr.msra.gmra.mxu2 %vm196_vm5, %v1290_v23 }
 0xc83   :  { %v532_v25 = vpop.f32.mrf.mxu2 }
 0xc84   :  { %v535_v26 = vadd.f32 %v532_v25, %v183_v24 }
 0xc86   :  { %924 = vtanh.f32 %v535_v26  ;;  %v859_v28 = vmul.f32 -1.442695, %v535_v26 }
 0xc88   :  { %926 = vpow2.f32 %v859_v28 }
 0xc8c   :  { %v925_v27 = vpop.eup %924 }
 0xc8d   :  { %558 = vrot.lane.b32.xlu2 %v925_v27, %s1106_s5 }
 0xc8e   :  { %v927_v29 = vpop.eup %926 }
 0xc8f   :  { %v539_v30 = vadd.f32 1.0, %v927_v29 }
 0xc91   :  { %928 = vrcp.f32 %v539_v30  ;;  %v551_v37 = vand.u32 2147483648, %v539_v30  ;;  %vm545_vm9 = vweird.f32 %v539_v30  ;;  %v549_v38 = vand.u32 2147483647, %v539_v30 }
 0xc93   :  { %v552_v40 = vor.u32 1.1754944e-38, %v551_v37  ;;  %vm550_vm11 = vcmp.eq.f32.partialorder %v549_v38, 8.507059e+37 }
 0xc97   :  { %v929_v32 = vpop.eup %928 }
 0xc98   :  { %v541_v33 = vmul.f32 %v929_v32, %v539_v30  ;;  %vm546_vm8 = vweird.f32 %v929_v32 }
 0xc99   :  { %vm547_vm10 = vmor %vm545_vm9, %vm546_vm8 }
 0xc9a   :  { %v542_v34 = vsub.f32 1.0, %v541_v33 }
 0xc9c   :  { %v543_v35 = vmul.f32 %v929_v32, %v542_v34 }
 0xc9e   :  { %v544_v36 = vadd.f32 %v929_v32, %v543_v35 }
 0xca0   :  { %v548_v39 = vsel %vm547_vm10, %v929_v32, %v544_v36 }
 0xca1   :  { %v553_v43 = vsel %vm550_vm11, %v552_v40, %v548_v39 }
 0xca2   :  { %v556_v45 = vmul.f32 %v553_v43, %v503_v18  ;;  %v189_v18 = vpop.f32.mrf.mxu1 }
 0xce7   :  { %v559_v42 = vpop.permute.xlu2 %558 }
 0xce8   :  { %v561_v44 = vmul.f32 %v559_v42, %v553_v43 }
 0xcea   :  { %563 = vrot.lane.b32.xlu0 %v561_v44, %s1107_s19 }
 0xd5c   :  { %v564_v46 = vpop.permute.xlu0 %563 }
 0xd5d   :  { %v566_v47 = vadd.f32 %v564_v46, %v556_v45 }
 0xd5f   :  { %930 = vtanh.f32 %v566_v47 }
 0xd65   :  { %v931_v48 = vpop.eup %930 }
 0xd66   :  { %569 = vrot.lane.b32.xlu1 %v931_v48, %s1106_s5  ;;  %v744_v48 = vld [vmem:[%s1356_s6 + $0x10] sm:$0xff] }
 0xdd8   :  { %v570_v49 = vpop.permute.xlu1 %569 }
 0xdd9   :  { %v572_v50 = vmul.f32 %v570_v49, %v553_v43  ;;  %v743_v49 = vld [vmem:[%s1356_s6 + $0x8] sm:$0xff] }
 0xddb   :  { %574 = vrot.lane.b32.xlu2 %v572_v50, %s1107_s19  ;;  %v742_v50 = vld [vmem:[%s1356_s6] sm:$0xff] }
 0xe35   :  { %v1299_v52 = vpop.permute.xlu2 %574 }
 0xe36   :  { %860 = vmatmul.msk.f32.vlgmr.msra.gmra.mxu3 %vm196_vm5, %v1299_v52 }
 0xeb9   :  { %v595_v54 = vpop.f32.mrf.mxu3 }
 0xeba   :  { %v598_v55 = vadd.f32 %v595_v54, %v186_v53  ;;  %v699_v53 = vld [vmem:[#allocation5] sm:$0xff]  ;;  %v700_v54 = vld [vmem:[#allocation5 + $0x8] sm:$0xff] }
 0xebc   :  { %932 = vtanh.f32 %v598_v55  ;;  %v861_v57 = vmul.f32 -1.442695, %v598_v55 }
 0xebe   :  { %934 = vpow2.f32 %v861_v57 }
 0xec2   :  { %v933_v56 = vpop.eup %932 }
 0xec3   :  { %621 = vrot.lane.b32.xlu0 %v933_v56, %s1106_s5 }
 0xec4   :  { %v935_v58 = vpop.eup %934 }
 0xec5   :  { %v602_v60 = vadd.f32 1.0, %v935_v58 }
 0xec7   :  { %936 = vrcp.f32 %v602_v60  ;;  %v614_v2 = vand.u32 2147483648, %v602_v60  ;;  %vm608_vm13 = vweird.f32 %v602_v60  ;;  %v612_v3 = vand.u32 2147483647, %v602_v60 }
 0xec9   :  { %v615_v6 = vor.u32 1.1754944e-38, %v614_v2  ;;  %vm613_vm15 = vcmp.eq.f32.partialorder %v612_v3, 8.507059e+37 }
 0xecd   :  { %v937_v61 = vpop.eup %936 }
 0xece   :  { %v604_v62 = vmul.f32 %v937_v61, %v602_v60  ;;  %vm609_vm12 = vweird.f32 %v937_v61 }
 0xecf   :  { %vm610_vm14 = vmor %vm608_vm13, %vm609_vm12 }
 0xed0   :  { %v605_v63 = vsub.f32 1.0, %v604_v62 }
 0xed2   :  { %v606_v0 = vmul.f32 %v937_v61, %v605_v63 }
 0xed4   :  { %v607_v1 = vadd.f32 %v937_v61, %v606_v0 }
 0xed6   :  { %v611_v5 = vsel %vm610_vm14, %v937_v61, %v607_v1 }
 0xed7   :  { %v616_v8 = vsel %vm613_vm15, %v615_v6, %v611_v5 }
 0xed8   :  { %v619_v10 = vmul.f32 %v616_v8, %v566_v47  ;;  %v745_v47 = vld [vmem:[%s1356_s6 + $0x18] sm:$0xff]  ;;  %s1109_s6 = smov [#allocation9]  }
 0xed9   :  { %768 = vmatpush.msrb.mxu3 %v745_v47  ;;  %s806_s28 = sshll.u32 %s1109_s6, 4  ;;  %s807_s28 = int_to_ptr.vmem [resolvable:$true] %s806_s28 }
 0xedb   :  { %769 = vmatpush.msrb.mxu3 %v744_v48 }
 0xedd   :  { %770 = vmatpush.msrb.mxu3 %v743_v49 }
 0xedf   :  { %771 = vmatpush.msrb.mxu3 %v742_v50 }
 0xf35   :  { %v622_v7 = vpop.permute.xlu0 %621 }
 0xf36   :  { %v624_v9 = vmul.f32 %v622_v7, %v616_v8 }
 0xf38   :  { %626 = vrot.lane.b32.xlu1 %v624_v9, %s1107_s19 }
 0xfaa   :  { %v627_v11 = vpop.permute.xlu1 %626 }
 0xfab   :  { %v629_v12 = vadd.f32 %v627_v11, %v619_v10 }
 0xfad   :  { %938 = vtanh.f32 %v629_v12 }
 0xfb3   :  { %v939_v13 = vpop.eup %938 }
 0xfb4   :  { %632 = vrot.lane.b32.xlu2 %v939_v13, %s1106_s5 }
0x100e   :  { %v633_v14 = vpop.permute.xlu2 %632 }
0x100f   :  { %v635_v15 = vmul.f32 %v633_v14, %v616_v8 }
0x1011   :  { %637 = vrot.lane.b32.xlu0 %v635_v15, %s1107_s19 }
0x1083   :  { %v638_v17 = vpop.permute.xlu0 %637 }
0x1084   :  { %862 = vmatmul.msk.f32.vlgmr.msrb.gmra.mxu0 %vm196_vm5, %v638_v17 }
0x1101   :  { %v658_v19 = vpop.f32.mrf.mxu0 }
0x1102   :  { %v661_v20 = vadd.f32 %v658_v19, %v189_v18 }
0x1104   :  { %940 = vtanh.f32 %v661_v20  ;;  %v863_v22 = vmul.f32 -1.442695, %v661_v20 }
0x1106   :  { %942 = vpow2.f32 %v863_v22 }
0x110a   :  { %v941_v21 = vpop.eup %940 }
0x110b   :  { %684 = vrot.lane.b32.xlu1 %v941_v21, %s1106_s5 }
0x110c   :  { %v943_v24 = vpop.eup %942 }
0x110d   :  { %v665_v25 = vadd.f32 1.0, %v943_v24 }
0x110f   :  { %944 = vrcp.f32 %v665_v25  ;;  %v677_v32 = vand.u32 2147483648, %v665_v25  ;;  %vm671_vm2 = vweird.f32 %v665_v25  ;;  %v675_v33 = vand.u32 2147483647, %v665_v25 }
0x1111   :  { %v678_v35 = vor.u32 1.1754944e-38, %v677_v32  ;;  %vm676_vm4 = vcmp.eq.f32.partialorder %v675_v33, 8.507059e+37 }
0x1115   :  { %v945_v26 = vpop.eup %944 }
0x1116   :  { %v667_v27 = vmul.f32 %v945_v26, %v665_v25  ;;  %vm672_vm1 = vweird.f32 %v945_v26 }
0x1117   :  { %vm673_vm3 = vmor %vm671_vm2, %vm672_vm1 }
0x1118   :  { %v668_v28 = vsub.f32 1.0, %v667_v27 }
0x111a   :  { %v669_v29 = vmul.f32 %v945_v26, %v668_v28 }
0x111c   :  { %v670_v30 = vadd.f32 %v945_v26, %v669_v29 }
0x111e   :  { %v674_v34 = vsel %vm673_vm3, %v945_v26, %v670_v30 }
0x111f   :  { %v679_v37 = vsel %vm676_vm4, %v678_v35, %v674_v34 }
0x1120   :  { %v682_v39 = vmul.f32 %v679_v37, %v629_v12 }
0x117d   :  { %v685_v36 = vpop.permute.xlu1 %684 }
0x117e   :  { %v687_v38 = vmul.f32 %v685_v36, %v679_v37 }
0x1180   :  { %689 = vrot.lane.b32.xlu2 %v687_v38, %s1107_s19 }
0x11da   :  { %v690_v40 = vpop.permute.xlu2 %689 }
0x11db   :  { %v692_v42 = vadd.f32 %v690_v40, %v682_v39 }
0x11dd   :  { %946 = vtanh.f32 %v692_v42  ;;  %784 = vrot.lane.b32.xlu2 %v692_v42, %s1108_s20 }
0x11e3   :  { %v947_v43 = vpop.eup %946 }
0x11e4   :  { %695 = vrot.lane.b32.xlu0 %v947_v43, %s1106_s5 }
0x1237   :  { %v785_v44 = vpop.permute.xlu2 %784 }
0x1238   :  { %787 = vst.msk [vmem:[#allocation11] sm:$0x3] %vm781_vm6, %v785_v44 }
0x1256   :  { %v696_v45 = vpop.permute.xlu0 %695 }
0x1257   :  { %v698_v46 = vmul.f32 %v696_v45, %v679_v37 }
0x1259   :  { %702 = vrot.lane.b32.xlu1 %v698_v46, %s1107_s19  ;;  %s794_s19 = sshll.u32 %s1358_s8, 4  ;;  %s795_s19 = int_to_ptr.hbm [resolvable:$true] %s794_s19 }
0x12cb   :  { %v703_v51 = vpop.permute.xlu1 %702 }
0x12cc   :  { %782 = vst.msk [vmem:[#allocation9] sm:$0x3] %vm781_vm6, %v703_v51  ;;  %727 = vmatpush.msrb.mxu2 %v703_v51 }
0x12cd   :  { %811 = dma.vmem_to_hbm [thread:$0]  %s807_s28, 32, %s809_s11, [#allocation10]  }
0x12ce   :  { %728 = vmatpush.msrb.mxu2 %v638_v17  ;;  %822 = dma.vmem_to_hbm [thread:$0]  %s818_s13, 32, %s820_s16, [#allocation10]  }
0x12d0   :  { %729 = vmatpush.msrb.mxu2 %v1299_v52 }
0x12d2   :  { %730 = vmatpush.msrb.mxu2 %v1290_v23 }
0x12d4   :  { %731 = vmatpush.msrb.mxu2 %v1281_v59 }
0x12d6   :  { %732 = vmatpush.msrb.mxu2 %v1272_v31 }
0x12d8   :  { %733 = vmatpush.msrb.mxu2 %v1263_v4 }
0x12da   :  { %734 = vmatpush.msrb.mxu2 %v1250_v41  ;;  %v883_v41 = vld [vmem:[%s1357_s7] ss:$0 sm:$0xff] }
0x12db   :  { %864 = vmatmul.msk.f32.vlgmr.msrb.gmra.mxu2 %vm712_vm7, %v699_v53 }
0x12e3   :  { %865 = vmatmul.msk.f32.gmra.mxu2 %vm712_vm7, %v700_v54 }
0x135e   :  { %v736_v55 = vpop.f32.mrf.mxu2 }
0x135f   :  { %866 = vmatmul.msk.f32.vlgmr.msrb.gmra.mxu3 %vm196_vm5, %v736_v55 }
0x1366   :  { %v739_v56 = vpop.f32.mrf.mxu2 }
0x1367   :  { %867 = vmatmul.msk.f32.gmra.mxu3 %vm196_vm5, %v739_v56 }
0x13e2   :  { %v773_v4 = vpop.f32.mrf.mxu3 }
0x13e3   :  { %v774_v31 = vadd.f32 %v883_v41, %v773_v4 }
0x13e5   :  { %779 = vst.msk [vmem:[#allocation8] sm:$0xff] %vm89_vm0, %v774_v31 }
0x13ea   :  { %v776_v59 = vpop.f32.mrf.mxu3 }
0x13eb   :  { %v777_v23 = vadd.f32 %v883_v41, %v776_v59 }
0x13ed   :  { %780 = vst.msk [vmem:[#allocation8 + $0x8] sm:$0xff] %vm89_vm0, %v777_v23 }
0x13ee   :  { %800 = dma.vmem_to_hbm [thread:$0]  %s793_s4, 256, %s795_s19, [#allocation4], %s1101_s21, %s1101_s21, %s1102_s22  }
0x13ef   :  { %1096 = dma.done.wait [#allocation4], 256  }
0x13f0   :  { %1097 = vsyncadd [#allocation4], 4294967040 }
0x13f1   :  { %1098 = dma.done.wait [#allocation10], 64  }
0x13f2   :  { %1099 = vsyncadd [#allocation10], 4294967232 }
0x13f3   :  { %835 = vsyncpa [#allocation3], 1 }
0x13f4   :  { %836 = vsyncpa [#allocation6], 1 }
0x13f5   :  { %837 = vsyncpa [#allocation4], 1 }
0x13f6   :  { %838 = vsyncpa [#allocation10], 1 }

</bundles_post_ra>
